<compile_context>
chip_gen: v7x
topology: tpu7x:2x2x1
jax: 0.10.0
libtpu: 0.0.40
codegen_flags: <defaults>
</compile_context>

<pallas_src>
import jax
import jax.numpy as jnp
from jax.experimental import pallas as pl
from jax.experimental.pallas import tpu as pltpu


def _round_up(n, m):
    return (n + m - 1) // m * m


def _encoder_kernel(xy_ref, w1_ref, b1_ref, w2_ref, b2_ref, out_ref):
    # fc1: relu(cat([x, y]) @ W1^T + b1)  — single fused K=128 matmul.
    h = jnp.dot(xy_ref[...], w1_ref[...], preferred_element_type=jnp.float32)
    h = jnp.maximum(h + b1_ref[...], 0.0)                       # f32 elementwise
    # fc2: single matmul producing the padded (mu | logvar | 0-pad) slab.
    out = jnp.dot(h.astype(w2_ref.dtype), w2_ref[...],
                  preferred_element_type=jnp.float32)
    out_ref[...] = out + b2_ref[...]                            # lane-dense store


def linear_encoder_forward(x, y, params, *, block_b=None):
    """Pallas forward pass. Returns (mu, logvar), each [B, latent_dim] f32."""
    B = x.shape[0]
    w1, b1 = params["w1"], params["b1"]
    w2, b2 = params["w2"], params["b2"]
    K, H = w1.shape                      # K = input_dim + cond_dim, H = 128
    n_out = w2.shape[1]                  # 2 * latent_dim
    latent_dim = n_out // 2
    n_pad = _round_up(n_out, 128)        # lane-dense output width

    # --- wrapper-side layout plumbing (free relative to the kernel) ----------
    xy = jnp.concatenate([x, y], axis=-1).astype(jnp.bfloat16)
    w1_b = w1.astype(jnp.bfloat16)
    w2_b = jnp.pad(w2, ((0, 0), (0, n_pad - n_out))).astype(jnp.bfloat16)
    b1_f = b1.astype(jnp.float32)
    b2_f = jnp.pad(b2, ((0, 0), (0, n_pad - n_out))).astype(jnp.float32)

    # Batch tiling: one grid step for small B; chunks of 512 rows otherwise.
    if block_b is None:
        block_b = B if B <= 512 else 512
    B_pad = _round_up(B, block_b)
    if B_pad != B:
        xy = jnp.pad(xy, ((0, B_pad - B), (0, 0)))
    grid = (B_pad // block_b,)

    out = pl.pallas_call(
        _encoder_kernel,
        out_shape=jax.ShapeDtypeStruct((B_pad, n_pad), jnp.float32),
        grid=grid,
        in_specs=[
            pl.BlockSpec((block_b, K), lambda i: (i, 0)),   # xy tile streams
            pl.BlockSpec((K, H),       lambda i: (0, 0)),   # w1 VMEM-resident
            pl.BlockSpec((1, H),       lambda i: (0, 0)),   # b1 VMEM-resident
            pl.BlockSpec((H, n_pad),   lambda i: (0, 0)),   # w2 VMEM-resident
            pl.BlockSpec((1, n_pad),   lambda i: (0, 0)),   # b2 VMEM-resident
        ],
        out_specs=pl.BlockSpec((block_b, n_pad), lambda i: (i, 0)),
        compiler_params=pltpu.CompilerParams(
            dimension_semantics=("parallel",)),
    )(xy, w1_b, b1_f, w2_b, b2_f)

    mu = out[:B, :latent_dim]
    logvar = out[:B, latent_dim:n_out]
    return mu, logvar


def init_params(key, input_dim, cond_dim, latent_dim, hidden=128):
    """Deterministic synthetic parameters (shapes match the nn.Linear layers,
    stored transposed: [in_features, out_features])."""
    k1, k2, k3, k4 = jax.random.split(key, 4)
    w1 = jax.random.normal(k1, (input_dim + cond_dim, hidden), jnp.float32) * 0.05
    b1 = jax.random.normal(k2, (1, hidden), jnp.float32) * 0.05
    w2 = jax.random.normal(k3, (hidden, 2 * latent_dim), jnp.float32) * 0.05
    b2 = jax.random.normal(k4, (1, 2 * latent_dim), jnp.float32) * 0.05
    return {"w1": w1, "b1": b1, "w2": w2, "b2": b2}


def _reference_forward(x, y, params):
    """Pure-JAX f32 reference mirroring the torch module exactly."""
    x_cond = jnp.concatenate([x, y], axis=-1)
    h = jax.nn.relu(x_cond @ params["w1"] + params["b1"])
    out = h @ params["w2"] + params["b2"]
    latent = params["w2"].shape[1] // 2
    return out[:, :latent], out[:, latent:]


if __name__ == "__main__":
    B, INPUT_DIM, COND_DIM, LATENT_DIM = 8, 96, 32, 32

    key = jax.random.PRNGKey(0)
    kx, ky, kp = jax.random.split(key, 3)
    x = jax.random.normal(kx, (B, INPUT_DIM), jnp.float32)
    y = jax.random.normal(ky, (B, COND_DIM), jnp.float32)
    params = init_params(kp, INPUT_DIM, COND_DIM, LATENT_DIM)

    mu, logvar = jax.jit(linear_encoder_forward)(x, y, params)
    jax.block_until_ready((mu, logvar))

    # Tolerance loosened vs the f32 reference because matmul operands are
    # bf16 (f32 accumulation) per the perf review.
    mu_ref, lv_ref = _reference_forward(x, y, params)
    assert mu.shape == (B, LATENT_DIM) and logvar.shape == (B, LATENT_DIM)
    assert jnp.allclose(mu, mu_ref, atol=5e-2, rtol=5e-2)
    assert jnp.allclose(logvar, lv_ref, atol=5e-2, rtol=5e-2)

    print("KERNEL_OK")
</pallas_src>

<mosaic_0001>
module attributes {stable_mosaic.version = 11 : i64} {
  func.func @_encoder_kernel(%arg0: i32, %arg1: memref<8x128xbf16, #tpu.memory_space<vmem>>, %arg2: memref<128x128xbf16, #tpu.memory_space<vmem>>, %arg3: memref<1x128xf32, #tpu.memory_space<vmem>>, %arg4: memref<128x128xbf16, #tpu.memory_space<vmem>>, %arg5: memref<1x128xf32, #tpu.memory_space<vmem>>, %arg6: memref<8x128xf32, #tpu.memory_space<vmem>>) attributes {dimension_semantics = [#tpu.dimension_semantics<parallel>], iteration_bounds = array<i64: 1>, scalar_prefetch = 0 : i64, scratch_operands = 0 : i64, tpu.core_type = #tpu.core_type<tc>, window_params = [{transform_indices = @transform_0, window_bounds = array<i64: 8, 128>}, {pipeline_mode = #tpu.pipeline_mode<synchronous>, transform_indices = @transform_1, window_bounds = array<i64: 128, 128>}, {pipeline_mode = #tpu.pipeline_mode<synchronous>, transform_indices = @transform_2, window_bounds = array<i64: 1, 128>}, {pipeline_mode = #tpu.pipeline_mode<synchronous>, transform_indices = @transform_3, window_bounds = array<i64: 128, 128>}, {pipeline_mode = #tpu.pipeline_mode<synchronous>, transform_indices = @transform_4, window_bounds = array<i64: 1, 128>}, {transform_indices = @transform_5, window_bounds = array<i64: 8, 128>}]} {
    %c0 = arith.constant 0 : index
    %c0_0 = arith.constant 0 : index
    %0 = vector.load %arg1[%c0, %c0_0] : memref<8x128xbf16, #tpu.memory_space<vmem>>, vector<8x128xbf16>
    %c0_1 = arith.constant 0 : index
    %c0_2 = arith.constant 0 : index
    %1 = vector.load %arg2[%c0_1, %c0_2] : memref<128x128xbf16, #tpu.memory_space<vmem>>, vector<128x128xbf16>
    %cst = arith.constant dense<0.000000e+00> : vector<8x128xf32>
    %2 = tpu.matmul %0, %1, %cst {dimension_numbers = #tpu.dot_dimension_numbers<[1], [0], [0], [1], [0, 0, 1, 1], [], []>} : vector<8x128xbf16>, vector<128x128xbf16>, vector<8x128xf32> -> vector<8x128xf32>
    %c0_3 = arith.constant 0 : index
    %c0_4 = arith.constant 0 : index
    %3 = vector.load %arg3[%c0_3, %c0_4] : memref<1x128xf32, #tpu.memory_space<vmem>>, vector<1x128xf32>
    %4 = vector.broadcast %3 : vector<1x128xf32> to vector<8x128xf32>
    %5 = arith.addf %2, %4 : vector<8x128xf32>
    %cst_5 = arith.constant 0.000000e+00 : f32
    %6 = vector.broadcast %cst_5 : f32 to vector<8x128xf32>
    %7 = arith.maximumf %5, %6 : vector<8x128xf32>
    %8 = arith.truncf %7 : vector<8x128xf32> to vector<8x128xbf16>
    %c0_6 = arith.constant 0 : index
    %c0_7 = arith.constant 0 : index
    %9 = vector.load %arg4[%c0_6, %c0_7] : memref<128x128xbf16, #tpu.memory_space<vmem>>, vector<128x128xbf16>
    %cst_8 = arith.constant dense<0.000000e+00> : vector<8x128xf32>
    %10 = tpu.matmul %8, %9, %cst_8 {dimension_numbers = #tpu.dot_dimension_numbers<[1], [0], [0], [1], [0, 0, 1, 1], [], []>} : vector<8x128xbf16>, vector<128x128xbf16>, vector<8x128xf32> -> vector<8x128xf32>
    %c0_9 = arith.constant 0 : index
    %c0_10 = arith.constant 0 : index
    %11 = vector.load %arg5[%c0_9, %c0_10] : memref<1x128xf32, #tpu.memory_space<vmem>>, vector<1x128xf32>
    %12 = vector.broadcast %11 : vector<1x128xf32> to vector<8x128xf32>
    %13 = arith.addf %10, %12 : vector<8x128xf32>
    %c0_11 = arith.constant 0 : index
    %c0_12 = arith.constant 0 : index
    %14 = vector.load %arg6[%c0_11, %c0_12] : memref<8x128xf32, #tpu.memory_space<vmem>>, vector<8x128xf32>
    tpu.vector_store %arg6[%c0_11, %c0_12], %13 {strides = array<i32>} : memref<8x128xf32, #tpu.memory_space<vmem>>, vector<8x128xf32>,
    return
  }
  func.func @transform_0(%arg0: i32) -> (i32, i32) {
    %c0_i32 = arith.constant 0 : i32
    %c0_i32_0 = arith.constant 0 : i32
    return %arg0, %c0_i32 : i32, i32
  }
  func.func @transform_1(%arg0: i32) -> (i32, i32) {
    %c0_i32 = arith.constant 0 : i32
    %c0_i32_0 = arith.constant 0 : i32
    %c0_i32_1 = arith.constant 0 : i32
    return %c0_i32, %c0_i32_0 : i32, i32
  }
  func.func @transform_2(%arg0: i32) -> (i32, i32) {
    %c0_i32 = arith.constant 0 : i32
    %c0_i32_0 = arith.constant 0 : i32
    %c0_i32_1 = arith.constant 0 : i32
    return %c0_i32, %c0_i32_0 : i32, i32
  }
  func.func @transform_3(%arg0: i32) -> (i32, i32) {
    %c0_i32 = arith.constant 0 : i32
    %c0_i32_0 = arith.constant 0 : i32
    %c0_i32_1 = arith.constant 0 : i32
    return %c0_i32, %c0_i32_0 : i32, i32
  }
  func.func @transform_4(%arg0: i32) -> (i32, i32) {
    %c0_i32 = arith.constant 0 : i32
    %c0_i32_0 = arith.constant 0 : i32
    %c0_i32_1 = arith.constant 0 : i32
    return %c0_i32, %c0_i32_0 : i32, i32
  }
  func.func @transform_5(%arg0: i32) -> (i32, i32) {
    %c0_i32 = arith.constant 0 : i32
    %c0_i32_0 = arith.constant 0 : i32
    return %arg0, %c0_i32 : i32, i32
  }
}

</mosaic_0001>

<bundles_post_ra>
// kernel: linear_encoder_forward.1
= control target key start
LH: loop header
LB: loop body
LE: loop exit
PB: predicated region body
PF: predicated region fallthrough
CT: control target
= control target key end

     0   :  { %v345_v0 = vmov 0.0   ;;  %vm346_vm0 = vmmov 0   ;;  %s437_s1 = inlined_call_operand.vmem [shape: bf16[128,128], index: 1, kind: input, shape index: {}]   ;;  %s438_s3 = inlined_call_operand.vmem [shape: bf16[128,128], index: 3, kind: input, shape index: {}]   ;;  %s439_s0 = inlined_call_operand.vmem [shape: bf16[8,128], index: 0, kind: input, shape index: {}]   ;;  %s440_s2 = inlined_call_operand.vmem [shape: f32[1,128], index: 2, kind: input, shape index: {}]   ;;  %s441_s4 = inlined_call_operand.vmem [shape: f32[1,128], index: 4, kind: input, shape index: {}]   ;;  %s442_s5 = inlined_call_operand.vmem [shape: f32[8,128], index: 5, kind: output, shape index: {}]  }
   0x1   :  { %287 = vmatprep.subr.bf16.mxu0 %v345_v0  ;;  %v329_v1 = vld [vmem:[%s437_s1] sm:$0xff]   ;;  %303 = vmatprep.mubr.msk.bf16.mxu0 %vm346_vm0, %v345_v0  ;;  %v330_v2 = vld [vmem:[%s437_s1 + $0x8] sm:$0xff]   ;;  %v331_v3 = vld [vmem:[%s437_s1 + $0x10] sm:$0xff]  }
   0x2   :  { %307 = vmatprep.subr.bf16.mxu1 %v345_v0  ;;  %323 = vmatprep.mubr.msk.bf16.mxu1 %vm346_vm0, %v345_v0  ;;  %v337_v4 = vld [vmem:[%s438_s3] sm:$0xff]   ;;  %v332_v5 = vld [vmem:[%s437_s1 + $0x18] sm:$0xff]   ;;  %v338_v6 = vld [vmem:[%s438_s3 + $0x8] sm:$0xff]  }
   0x3   :  { %288 = vmatpush3.bf16.msra.mxu0 %v329_v1  ;;  %308 = vmatpush3.bf16.msra.mxu1 %v337_v4  ;;  %v333_v7 = vld [vmem:[%s437_s1 + $0x20] sm:$0xff]   ;;  %v339_v8 = vld [vmem:[%s438_s3 + $0x10] sm:$0xff]   ;;  %v334_v9 = vld [vmem:[%s437_s1 + $0x28] sm:$0xff]  }
   0x4   :  { %289 = vmatprep.subr.bf16.mxu0 %v345_v0  ;;  %309 = vmatprep.subr.bf16.mxu1 %v345_v0  ;;  %v340_v10 = vld [vmem:[%s438_s3 + $0x18] sm:$0xff]   ;;  %v335_v11 = vld [vmem:[%s437_s1 + $0x30] sm:$0xff]   ;;  %v341_v12 = vld [vmem:[%s438_s3 + $0x20] sm:$0xff]  }
   0x5   :  { %v336_v13 = vld [vmem:[%s437_s1 + $0x38] sm:$0xff]   ;;  %v342_v14 = vld [vmem:[%s438_s3 + $0x28] sm:$0xff]   ;;  %v21_v15 = vld [vmem:[%s439_s0] sm:$0xf] }
   0x6   :  { %v343_v16 = vld [vmem:[%s438_s3 + $0x30] sm:$0xff]   ;;  %v344_v17 = vld [vmem:[%s438_s3 + $0x38] sm:$0xff]   ;;  %v251_v18 = vld [vmem:[%s440_s2] ss:$0 sm:$0xff] }
   0x7   :  { %290 = vmatpush3.bf16.msra.mxu0 %v330_v2  ;;  %310 = vmatpush3.bf16.msra.mxu1 %v338_v6  ;;  %v260_v26 = vld [vmem:[%s441_s4] ss:$0 sm:$0xff] }
   0x8   :  { %291 = vmatprep.subr.bf16.mxu0 %v345_v0  ;;  %311 = vmatprep.subr.bf16.mxu1 %v345_v0 }
   0xb   :  { %292 = vmatpush3.bf16.msra.mxu0 %v331_v3  ;;  %312 = vmatpush3.bf16.msra.mxu1 %v339_v8 }
   0xc   :  { %293 = vmatprep.subr.bf16.mxu0 %v345_v0  ;;  %313 = vmatprep.subr.bf16.mxu1 %v345_v0 }
   0xf   :  { %294 = vmatpush3.bf16.msra.mxu0 %v332_v5  ;;  %314 = vmatpush3.bf16.msra.mxu1 %v340_v10 }
  0x10   :  { %295 = vmatprep.subr.bf16.mxu0 %v345_v0  ;;  %315 = vmatprep.subr.bf16.mxu1 %v345_v0 }
  0x13   :  { %296 = vmatpush3.bf16.msra.mxu0 %v333_v7  ;;  %316 = vmatpush3.bf16.msra.mxu1 %v341_v12 }
  0x14   :  { %297 = vmatprep.subr.bf16.mxu0 %v345_v0  ;;  %317 = vmatprep.subr.bf16.mxu1 %v345_v0 }
  0x17   :  { %298 = vmatpush3.bf16.msra.mxu0 %v334_v9  ;;  %318 = vmatpush3.bf16.msra.mxu1 %v342_v14 }
  0x18   :  { %299 = vmatprep.subr.bf16.mxu0 %v345_v0  ;;  %319 = vmatprep.subr.bf16.mxu1 %v345_v0 }
  0x1b   :  { %300 = vmatpush3.bf16.msra.mxu0 %v335_v11  ;;  %320 = vmatpush3.bf16.msra.mxu1 %v343_v16 }
  0x1c   :  { %301 = vmatprep.subr.bf16.mxu0 %v345_v0  ;;  %321 = vmatprep.subr.bf16.mxu1 %v345_v0 }
  0x1f   :  { %302 = vmatpush3.bf16.msra.mxu0 %v336_v13  ;;  %322 = vmatpush3.bf16.msra.mxu1 %v344_v17 }
  0x22   :  { %304 = vmatmul.mubr.bf16.vlgmr.msra.gmra.mrb[0].mxu0 %v21_v15 }
  0xf5   :  { %v127_v19 = vpop.f32.mrb[0].mxu0 }
  0xf6   :  { %v128_v20 = vadd.f32 %v251_v18, %v127_v19  ;;  %v305_v21 = vpop.f32.mrb[1].mxu0 }
  0xf7   :  { %v130_v22 = vpop.f32.mrb[2].mxu0 }
  0xf8   :  { %v133_v23 = vmax.f32 %v128_v20, 0.0  ;;  %v306_v24 = vpop.f32.mrb[3].mxu0 }
  0xfa   :  { %v134_v25 = vpack.c.bf16 %v133_v23, %v133_v23 }
  0xfc   :  { %324 = vmatmul.mubr.bf16.vlgmr.msra.gmra.mrb[0].mxu1 %v134_v25 }
 0x1cf   :  { %v240_v27 = vpop.f32.mrb[0].mxu1 }
 0x1d0   :  { %v241_v28 = vadd.f32 %v260_v26, %v240_v27  ;;  %v325_v29 = vpop.f32.mrb[1].mxu1 }
 0x1d1   :  { %v243_v30 = vpop.f32.mrb[2].mxu1 }
 0x1d2   :  { %246 = vst [vmem:[%s442_s5] sm:$0xff] %v241_v28  ;;  %v326_v31 = vpop.f32.mrb[3].mxu1 }

</bundles_post_ra>
